<compile_context>
chip_gen: v6e
topology: v6e:2x2x1
jax: 0.10.0
libtpu: 0.0.40
codegen_flags: <defaults>
</compile_context>

<pallas_src>
import jax
import jax.numpy as jnp
from jax.experimental import pallas as pl
from jax.experimental.pallas import tpu as pltpu

_LANE = 128
_SUBLANE = 8
_MIB = 1024 * 1024


def _round_down(x, m):
    return (x // m) * m


def _round_up(x, m):
    return ((x + m - 1) // m) * m


def _vmem_capacity_bytes():
    """Physical VMEM per TensorCore; falls back to the tightest value (v7x, 64 MiB)."""
    try:
        cap = int(pltpu.get_tpu_info().vmem_capacity_bytes)
        if cap > 0:
            return cap
    except Exception:
        pass
    return 64 * _MIB


def _parallel_semantics(axis_blocks):
    """PARALLEL normally; CORE_PARALLEL on v7x (2 TCs/chip) when there is work to split."""
    try:
        kind = jax.devices()[0].device_kind.lower()
    except Exception:
        kind = ""
    if ("v7" in kind or "7x" in kind) and axis_blocks >= 2:
        return pltpu.CORE_PARALLEL
    return pltpu.PARALLEL


# ----------------------------- kernels --------------------------------------

def _wsum_single_kernel(theta_ref, mats_ref, out_ref):
    # theta_ref: (N0, 1) f32, mats_ref: (N0, M) f32, out_ref: (1, M) f32
    th = theta_ref[...]
    inv_norm = jax.lax.rsqrt(jnp.sum(th * th))            # exact rsqrt (see header)
    out_ref[...] = jnp.sum((th * inv_norm) * mats_ref[...], axis=0, keepdims=True)


def _wsum_m_tiled_kernel(thn_ref, mats_ref, out_ref):
    # thn_ref: (N0, 1) pre-normalized; mats_ref: (N0, TILE_M); out: (1, TILE_M)
    out_ref[...] = jnp.sum(thn_ref[...] * mats_ref[...], axis=0, keepdims=True)


def _wsum_mn_tiled_kernel(thn_ref, mats_ref, out_ref, acc_ref):
    # Grid = (M tiles, N0 tiles); N0 is the last ("arbitrary") reduction axis.
    k = pl.program_id(1)

    @pl.when(k == 0)
    def _():
        acc_ref[...] = jnp.zeros_like(acc_ref)

    acc_ref[...] += jnp.sum(thn_ref[...] * mats_ref[...], axis=0, keepdims=True)

    @pl.when(k == pl.num_programs(1) - 1)
    def _():
        out_ref[...] = acc_ref[...]


# ----------------------------- wrapper ---------------------------------------

def weighted_matrix_sum(theta, mats_flat, *, path="auto", tile_m=None, tile_n0=None):
    """out[0, :] = sum_i (theta_i / ||theta||) * mats_flat[i, :].

    theta: (N0,) f32;  mats_flat: (N0, M) f32  ->  (1, M) f32.
    """
    mats_flat = mats_flat.astype(jnp.float32)
    N0, M = mats_flat.shape
    theta_col = theta.reshape(N0, 1).astype(jnp.float32)

    vmem_cap = _vmem_capacity_bytes()
    budget = (vmem_cap * 3) // 5                     # ~60% of physical VMEM
    vmem_ceiling = (vmem_cap * 3) // 4               # never ask for more than ~75%

    slab_bytes = (N0 * M + N0 + M) * 4               # whole problem resident in VMEM

    if path == "auto":
        if slab_bytes <= min(budget, 24 * _MIB):
            path = "single"                          # grid-less: no per-step overhead
        elif 2 * N0 * 512 * 4 <= budget // 2:        # a >=512-wide full-N0 strip fits (2 bufs)
            path = "tiled_m"
        else:
            path = "tiled_mn"                        # N0 too large: reduction axis needed

    if path == "single":
        vmem_limit = int(min(max(2 * slab_bytes + 4 * _MIB, 16 * _MIB), vmem_ceiling))
        return pl.pallas_call(
            _wsum_single_kernel,
            out_shape=jax.ShapeDtypeStruct((1, M), jnp.float32),
            compiler_params=pltpu.CompilerParams(vmem_limit_bytes=vmem_limit),
        )(theta_col, mats_flat)

    # Tiled paths: theta normalization is loop-invariant -> computed once here (XLA).
    thn_col = theta_col * jax.lax.rsqrt(jnp.sum(theta_col * theta_col))

    if path == "tiled_m":
        if tile_m is None:
            # Per-block DMA as large as the (double-buffered) budget allows,
            # clamped to [512, round_up(M, 128)]; always a multiple of 128 lanes.
            tile_m_budget = _round_down((budget // 2) // (2 * N0 * 4), _LANE)
            tile_m = min(_round_up(M, _LANE), max(512, tile_m_budget))
        assert tile_m % _LANE == 0
        grid = (pl.cdiv(M, tile_m),)
        blk_bytes = 2 * (N0 * tile_m + tile_m + N0) * 4      # double-buffered blocks
        vmem_limit = int(min(max(blk_bytes + 4 * _MIB, 16 * _MIB), vmem_ceiling))
        return pl.pallas_call(
            _wsum_m_tiled_kernel,
            out_shape=jax.ShapeDtypeStruct((1, M), jnp.float32),
            grid=grid,
            in_specs=[
                pl.BlockSpec((N0, 1), lambda j: (0, 0)),        # replicated theta
                pl.BlockSpec((N0, tile_m), lambda j: (0, j)),   # lane-dense tiles
            ],
            out_specs=pl.BlockSpec((1, tile_m), lambda j: (0, j)),
            compiler_params=pltpu.CompilerParams(
                dimension_semantics=(_parallel_semantics(grid[0]),),
                vmem_limit_bytes=vmem_limit),
        )(thn_col, mats_flat)

    # path == "tiled_mn": reduction grid axis over N0 (last, "arbitrary").
    if tile_m is None:
        tile_m = min(2048, _round_up(M, _LANE))
    if tile_n0 is None:
        tile_n0 = _round_down((budget // 2) // (2 * tile_m * 4), _SUBLANE)
        tile_n0 = max(_SUBLANE, min(tile_n0, _round_up(N0, _SUBLANE)))
    assert tile_m % _LANE == 0 and tile_n0 % _SUBLANE == 0
    # Zero-pad N0 so every (tile_n0) block is fully in-bounds; padded theta rows
    # are exactly zero, so they contribute nothing to the reduction.
    N0p = _round_up(N0, tile_n0)
    if N0p != N0:
        thn_col = jnp.pad(thn_col, ((0, N0p - N0), (0, 0)))
        mats_flat = jnp.pad(mats_flat, ((0, N0p - N0), (0, 0)))
    grid = (pl.cdiv(M, tile_m), N0p // tile_n0)
    blk_bytes = 2 * (tile_n0 * tile_m + tile_m + tile_n0) * 4 + tile_m * 4  # + acc scratch
    vmem_limit = int(min(max(blk_bytes + 4 * _MIB, 16 * _MIB), vmem_ceiling))
    return pl.pallas_call(
        _wsum_mn_tiled_kernel,
        out_shape=jax.ShapeDtypeStruct((1, M), jnp.float32),
        grid=grid,
        in_specs=[
            pl.BlockSpec((tile_n0, 1), lambda j, k: (k, 0)),
            pl.BlockSpec((tile_n0, tile_m), lambda j, k: (k, j)),
        ],
        out_specs=pl.BlockSpec((1, tile_m), lambda j, k: (0, j)),
        scratch_shapes=[pltpu.VMEM((1, tile_m), jnp.float32)],
        compiler_params=pltpu.CompilerParams(
            dimension_semantics=(_parallel_semantics(grid[0]), pltpu.ARBITRARY),
            vmem_limit_bytes=vmem_limit),
    )(thn_col, mats_flat)


def max_eigen_degeneracy_loss(theta, mats_flat, d, indI=-3):
    # Hot path (linear combination of the matrix basis) in Pallas.
    out = weighted_matrix_sum(theta, mats_flat)      # (1, 2*d*d), lane-dense
    out = out.reshape(2, d, d)
    A = out[0] + 1j * out[1]                         # complex64 (d, d) Hermitian
    # TODO(synk): Hermitian eigendecomposition has no Pallas TPU equivalent; it
    # stays in XLA (jnp.linalg.eigvalsh), as does the trivial scalar loss.
    evl = jnp.linalg.eigvalsh(A)                     # ascending, real
    return (evl[-1] - evl[indI]) ** 2


def _make_problem(key, N0, d):
    k1, k2, k3 = jax.random.split(key, 3)
    Br = jax.random.normal(k1, (N0, d, d), dtype=jnp.float32)
    Bi = jax.random.normal(k2, (N0, d, d), dtype=jnp.float32)
    B = Br + 1j * Bi
    matrix_space = 0.5 * (B + jnp.conj(jnp.swapaxes(B, 1, 2)))   # Hermitian stack
    theta0 = jax.random.uniform(k3, (N0,), minval=-1.0, maxval=1.0,
                                dtype=jnp.float32)
    theta = theta0 / jnp.linalg.norm(theta0)          # matches module __init__
    mats_flat = jnp.concatenate(
        [jnp.real(matrix_space).reshape(N0, d * d),
         jnp.imag(matrix_space).reshape(N0, d * d)], axis=1)     # (N0, 2*d*d)
    return matrix_space, theta, mats_flat


if __name__ == "__main__":
    key = jax.random.PRNGKey(0)
    kA, kB, kC = jax.random.split(key, 3)

    # --- small problem (module-consistent shapes); auto -> grid-less path ----
    N0, d, indI = 8, 16, -3
    matrix_space, theta, mats_flat = _make_problem(kA, N0, d)

    loss = max_eigen_degeneracy_loss(theta, mats_flat, d, indI=indI)
    jax.block_until_ready(loss)

    # Pure-JAX reference for the full forward pass.
    thn = theta / jnp.linalg.norm(theta)
    A_ref = jnp.einsum("i,ijk->jk", thn.astype(jnp.complex64), matrix_space)
    evl_ref = jnp.linalg.eigvalsh(A_ref)
    loss_ref = (evl_ref[-1] - evl_ref[indI]) ** 2
    assert jnp.allclose(loss, loss_ref, rtol=1e-3, atol=1e-3), (loss, loss_ref)

    # --- force the M-tiled path (exercises grid + parallel semantics) --------
    d_big = 64                                        # M = 2*d*d = 8192
    _, theta_big, mats_big = _make_problem(kB, N0, d_big)
    out_m = weighted_matrix_sum(theta_big, mats_big, path="tiled_m", tile_m=2048)
    jax.block_until_ready(out_m)
    thn_big = theta_big / jnp.linalg.norm(theta_big)
    ref_m = thn_big[None, :] @ mats_big
    assert jnp.allclose(out_m, ref_m, rtol=1e-4, atol=1e-4)

    # --- force the (M, N0)-tiled reduction path (accumulator + N0 padding) ---
    N0_mn, d_mn = 12, 32                              # N0 not a multiple of 8, M = 2048
    _, theta_mn, mats_mn = _make_problem(kC, N0_mn, d_mn)
    out_mn = weighted_matrix_sum(theta_mn, mats_mn, path="tiled_mn",
                                 tile_m=512, tile_n0=8)
    jax.block_until_ready(out_mn)
    thn_mn = theta_mn / jnp.linalg.norm(theta_mn)
    ref_mn = thn_mn[None, :] @ mats_mn
    assert jnp.allclose(out_mn, ref_mn, rtol=1e-4, atol=1e-4)

    print("KERNEL_OK")
</pallas_src>

<mosaic_0001>
module attributes {stable_mosaic.version = 11 : i64} {
  func.func @_wsum_single_kernel(%arg0: memref<8x1xf32, #tpu.memory_space<vmem>>, %arg1: memref<8x512xf32, #tpu.memory_space<vmem>>, %arg2: memref<1x512xf32, #tpu.memory_space<vmem>>) attributes {dimension_semantics = [], scalar_prefetch = 0 : i64, scratch_operands = 0 : i64, tpu.core_type = #tpu.core_type<tc>} {
    %c0 = arith.constant 0 : index
    %c0_0 = arith.constant 0 : index
    %0 = vector.load %arg0[%c0, %c0_0] : memref<8x1xf32, #tpu.memory_space<vmem>>, vector<8x1xf32>
    %1 = arith.mulf %0, %0 : vector<8x1xf32>
    %2 = vector.shape_cast %1 : vector<8x1xf32> to vector<1x8x1xf32>
    %cst = arith.constant dense<0.000000e+00> : vector<1xf32>
    %3 = vector.multi_reduction <add>, %2, %cst [1, 2] : vector<1x8x1xf32> to vector<1xf32>
    %4 = vector.shape_cast %3 : vector<1xf32> to vector<1x1x1xf32>
    %5 = vector.extract %4[0, 0, 0] : f32 from vector<1x1x1xf32>
    %6 = math.rsqrt %5 : f32
    %7 = vector.broadcast %6 : f32 to vector<8x1xf32>
    %8 = arith.mulf %0, %7 : vector<8x1xf32>
    %c0_1 = arith.constant 0 : index
    %c0_2 = arith.constant 0 : index
    %9 = vector.load %arg1[%c0_1, %c0_2] : memref<8x512xf32, #tpu.memory_space<vmem>>, vector<8x512xf32>
    %10 = vector.broadcast %8 : vector<8x1xf32> to vector<8x512xf32>
    %11 = arith.mulf %10, %9 : vector<8x512xf32>
    %cst_3 = arith.constant dense<0.000000e+00> : vector<512xf32>
    %12 = vector.multi_reduction <add>, %11, %cst_3 [0] : vector<8x512xf32> to vector<512xf32>
    %13 = vector.shape_cast %12 : vector<512xf32> to vector<1x512xf32>
    %c0_4 = arith.constant 0 : index
    %c0_5 = arith.constant 0 : index
    %14 = vector.load %arg2[%c0_4, %c0_5] : memref<1x512xf32, #tpu.memory_space<vmem>>, vector<1x512xf32>
    tpu.vector_store %arg2[%c0_4, %c0_5], %13 {strides = array<i32>} : memref<1x512xf32, #tpu.memory_space<vmem>>, vector<1x512xf32>,
    return
  }
}

</mosaic_0001>

<bundles_post_ra>
// kernel: tpu_custom_call.1
= control target key start
LH: loop header
LB: loop body
LE: loop exit
PB: predicated region body
PF: predicated region fallthrough
CT: control target
= control target key end

     0   :  { %7 = vsyncpa [#allocation3], 0  ;;  %s211_s0 = inlined_call_operand.vmem [shape: f32[8,1], index: 0, kind: input, shape index: {}]   ;;  %s212_s1 = inlined_call_operand.hbm [shape: f32[8,512], index: 1, kind: input, shape index: {}]   ;;  %s213_s2 = inlined_call_operand.hbm [shape: f32[1,512], index: 2, kind: output, shape index: {}]  }
   0x1   :  { %8 = vsyncpa [#allocation4], 0  ;;  %s183_s9 = smov [#allocation2]  }
   0x2   :  { %s17_s10 = sshll.u32 %s183_s9, 4  ;;  %s18_s10 = int_to_ptr.vmem [resolvable:$true] %s17_s10 }
   0x3   :  { %s147_s11 = scalar_lea.vmem %s18_s10, 512  ;;  %p152_p1 = scmp.lt.s32.totalorder %s18_s10, %s18_s10 }
   0x4   :  { %p148_p0 = scmp.ne.s32.totalorder %s18_s10, %s147_s11  ;;  %p153_p2 = scmp.lt.s32.totalorder %s147_s11, %s147_s11 }
   0x6   :  { %p154_p3 = por %p153_p2, %p152_p1 }
   0x8   :  { %p155_p4 = pnand %p154_p3, %p148_p0 }
   0xa   :  { %158 = shalt.err (!%p155_p4)
}
   0xb   :  { %20 = dma.hbm_to_vmem [thread:$0]  %s212_s1, 512, %s18_s10, [#allocation3]  }
   0xc   :  { %179 = dma.done.wait [#allocation3], 512  }
   0xd   :  { %180 = vsyncadd [#allocation3], 4294966784  ;;  %v24_v0 = vld [vmem:[%s211_s0] sm:$0xff]  ;;  %vm26_vm0 = vcmask 7168   ;;  %v184_v5 = vmov 0   ;;  %v43_v16 = vld [vmem:[#allocation2 + $0x8] sm:$0xff]  ;;  %v88_v30 = vlaneseq }
   0xe   :  { %v25_v1 = vmul.f32 %v24_v0, %v24_v0  ;;  %136 = vset.pattern.permute.xlu0 %v184_v5  ;;  %v42_v15 = vld [vmem:[#allocation2] sm:$0xff]  ;;  %v44_v17 = vld [vmem:[#allocation2 + $0x10] sm:$0xff]  ;;  %v45_v18 = vld [vmem:[#allocation2 + $0x18] sm:$0xff]  ;;  %v185_v28 = vmov 1966171168   ;;  %s186_s16 = smov [#allocation5]  }
   0xf   :  { %v86_v29 = vunpack.c.l.s4 %v185_v28  ;;  %v89_v40 = vshrl.u32 %v88_v30, 7  ;;  %s119_s17 = sshll.u32 %s186_s16, 4  ;;  %vm110_vm1 = vcmp.lt.s32.totalorder %v88_v30, 512  ;;  %s120_s17 = int_to_ptr.vmem [resolvable:$true] %s119_s17 }
  0x10   :  { %v27_v2 = vsel %vm26_vm0, %v25_v1, 0.0  ;;  %s159_s18 = scalar_lea.vmem %s120_s17, 64  ;;  %p164_p6 = scmp.lt.s32.totalorder %s120_s17, %s120_s17 }
  0x11   :  { %28 = vadd.xlane.f32.xlu0 %v27_v2  ;;  %v87_v39 = vunpack.c.0.s8 %v86_v29  ;;  %p160_p5 = scmp.ne.s32.totalorder %s120_s17, %s159_s18  ;;  %p165_p7 = scmp.lt.s32.totalorder %s159_s18, %s159_s18 }
  0x13   :  { %v90_v49 = vsub.s32 %v87_v39, %v89_v40  ;;  %p166_p8 = por %p165_p7, %p164_p6 }
  0x15   :  { %p167_p9 = pnand %p166_p8, %p160_p5 }
  0x9a   :  { %v29_v3 = vpop.xlane.xlu0 %28 }
  0x9b   :  { %v30_v4 = vrot.slane %v29_v3, 4 }
  0x9d   :  { %v31_v6 = vadd.f32 %v30_v4, %v29_v3 }
  0x9f   :  { %v32_v7 = vrot.slane %v31_v6, 2 }
  0xa1   :  { %v33_v8 = vadd.f32 %v32_v7, %v31_v6 }
  0xa3   :  { %v34_v9 = vrot.slane %v33_v8, 1 }
  0xa5   :  { %v35_v10 = vadd.f32 %v34_v9, %v33_v8 }
  0xa7   :  { %128 = vpush %v35_v10 }
  0xd8   :  { %s129_s1 = spop %128 }
  0xd9   :  { %v37_v11 = vstv %s129_s1 }
  0xda   :  { %137 = vrsqrt.f32 %v37_v11 }
  0xe7   :  { %v138_v12 = vpop.eup %137 }
  0xe8   :  { %130 = vpush %v138_v12 }
 0x119   :  { %s131_s0 = spop %130 }
 0x11a   :  { %v40_v13 = vstv %s131_s0 }
 0x11b   :  { %v41_v14 = vmul.f32 %v40_v13, %v24_v0 }
 0x11d   :  { %48 = vperm.xlu0 %136, %v41_v14  }
 0x198   :  { %v49_v19 = vpop.permute.xlu0 %48 }
 0x199   :  { %v51_v20 = vmul.f32 %v49_v19, %v42_v15  ;;  %v52_v21 = vmul.f32 %v49_v19, %v43_v16  ;;  %v53_v22 = vmul.f32 %v49_v19, %v44_v17  ;;  %v54_v23 = vmul.f32 %v49_v19, %v45_v18 }
 0x19b   :  { %v55_v24 = vrot.slane %v51_v20, 4  ;;  %v61_v25 = vrot.slane %v52_v21, 4  ;;  %v67_v26 = vrot.slane %v53_v22, 4  ;;  %v73_v27 = vrot.slane %v54_v23, 4 }
 0x19d   :  { %v56_v31 = vadd.f32 %v55_v24, %v51_v20  ;;  %v62_v32 = vadd.f32 %v61_v25, %v52_v21  ;;  %v68_v33 = vadd.f32 %v67_v26, %v53_v22  ;;  %v74_v34 = vadd.f32 %v73_v27, %v54_v23 }
 0x19f   :  { %v57_v35 = vrot.slane %v56_v31, 2  ;;  %v63_v36 = vrot.slane %v62_v32, 2  ;;  %v69_v37 = vrot.slane %v68_v33, 2  ;;  %v75_v38 = vrot.slane %v74_v34, 2 }
 0x1a1   :  { %v58_v41 = vadd.f32 %v57_v35, %v56_v31  ;;  %v64_v42 = vadd.f32 %v63_v36, %v62_v32  ;;  %v70_v43 = vadd.f32 %v69_v37, %v68_v33  ;;  %v76_v44 = vadd.f32 %v75_v38, %v74_v34 }
 0x1a3   :  { %v59_v45 = vrot.slane %v58_v41, 1  ;;  %v65_v46 = vrot.slane %v64_v42, 1  ;;  %v71_v47 = vrot.slane %v70_v43, 1  ;;  %v77_v48 = vrot.slane %v76_v44, 1 }
 0x1a5   :  { %v60_v50 = vadd.f32 %v59_v45, %v58_v41  ;;  %v66_v51 = vadd.f32 %v65_v46, %v64_v42  ;;  %v72_v52 = vadd.f32 %v71_v47, %v70_v43  ;;  %v78_v53 = vadd.f32 %v77_v48, %v76_v44 }
 0x1a7   :  { %v83_v54 = vcombine.low %v60_v50, %v66_v51  ;;  %v84_v55 = vcombine.low %v72_v52, %v78_v53 }
 0x1a9   :  { %v91_v56 = vrot.slane %v83_v54, %v90_v49  ;;  %v98_v57 = vrot.slane %v84_v55, %v90_v49 }
 0x1ab   :  { %v99_v58 = vcombine.low %v91_v56, %v98_v57 }
 0x1ad   :  { %v106_v59 = vrot.slane %v99_v58, %v90_v49 }
 0x1af   :  { %112 = vst.msk [vmem:[#allocation5] sm:$0xf] %vm110_vm1, %v106_v59 }
 0x1b0   :  { %170 = shalt.err (!%p167_p9)
}
 0x1b1   :  { %122 = dma.vmem_to_hbm [thread:$0]  %s120_s17, 64, %s213_s2, [#allocation4]  }
 0x1b2   :  { %181 = dma.done.wait [#allocation4], 64  }
 0x1b3   :  { %182 = vsyncadd [#allocation4], 4294967232 }
 0x1b4   :  { %126 = vsyncpa [#allocation3], 1 }
 0x1b5   :  { %127 = vsyncpa [#allocation4], 1 }

</bundles_post_ra>
